<compile_context>
chip_gen: v5e
topology: v5e:2x2
jax: 0.10.0
libtpu: 0.0.40
codegen_flags: <defaults>
</compile_context>

<pallas_src>
import jax
import jax.numpy as jnp
from jax.experimental import pallas as pl
from jax.experimental.pallas import tpu as pltpu


def _disc_kernel(x_ref, w1_ref, b1_ref, w2_ref, b2_ref, o_ref):
    # x_ref : [bm, F] bf16      w1_ref: [F, H] bf16     b1_ref: [1, H] f32
    # w2_ref: [1, H]  f32       b2_ref: [1, 1] f32 (SMEM scalar)
    # o_ref : [1, bm] f32  (lane-dense output row for this batch tile)

    # Linear 1 on the MXU, accumulate in f32.
    h = jnp.dot(x_ref[...], w1_ref[...], preferred_element_type=jnp.float32)
    h = h + b1_ref[...]

    # LeakyReLU(0.1): slope < 1 so max(h, 0.1*h) == leaky_relu(h).  2 VPU ops.
    h = jnp.maximum(h, 0.1 * h)

    # Linear 2 (out_features = 1): VPU multiply + cross-lane (XLU) reduce,
    # instead of a degenerate single-column MXU matmul.
    z = jnp.sum(h * w2_ref[...], axis=-1) + b2_ref[0, 0]          # (bm,)

    # Sigmoid: exp and approximate reciprocal both go to the EUP slot.
    sig = pl.reciprocal(1.0 + jnp.exp(-z), approx=True)

    # Lane-dense store: one row of bm lanes (vs. bm 1-lane masked stores).
    o_ref[0, :] = sig


def _pick_bm(B):
    """Largest multiple-of-8 divisor of B, capped at 512 rows per tile."""
    if B % 8 != 0:
        return B                      # tiny / odd batch: single full tile
    bm = 8
    for cand in range(8, min(B, 512) + 1, 8):
        if B % cand == 0:
            bm = cand
    # If that leaves a single grid step but the batch is splittable, halve it
    # so the grid has >= 2 steps (lets v7x shard the batch across its 2 TCs).
    if B // bm == 1 and bm % 16 == 0:
        bm //= 2
    return bm


def discriminator_forward(x, w1, b1, w2, b2, *, bm=None):
    """Forward pass: x [B, F] f32 -> [B, 1] f32.

    w1: [F, H] (transpose of nn.Linear weight), b1: [H] or [1, H],
    w2: [H, 1] or [H], b2: scalar-like.
    """
    x = jnp.asarray(x, jnp.float32)
    B, F = x.shape
    H = w1.shape[1]
    assert w1.shape == (F, H)

    # Normalize / lay out parameters for the kernel.
    w1_bf = w1.astype(jnp.bfloat16)
    x_bf = x.astype(jnp.bfloat16)
    b1_row = jnp.asarray(b1, jnp.float32).reshape(1, H)
    w2_row = jnp.asarray(w2, jnp.float32).reshape(1, H)   # second layer as a row
    b2_s = jnp.asarray(b2, jnp.float32).reshape(1, 1)

    if bm is None:
        bm = _pick_bm(B)
    assert B % bm == 0, "batch tile must divide the batch"
    grid_n = B // bm

    out = pl.pallas_call(
        _disc_kernel,
        out_shape=jax.ShapeDtypeStruct((grid_n, bm), jnp.float32),
        grid_spec=pltpu.PrefetchScalarGridSpec(
            num_scalar_prefetch=0,
            grid=(grid_n,),
            in_specs=[
                pl.BlockSpec((bm, F), lambda i: (i, 0)),             # x tile (bf16)
                pl.BlockSpec((F, H), lambda i: (0, 0)),              # w1 (bf16, replicated)
                pl.BlockSpec((1, H), lambda i: (0, 0)),              # b1 (f32)
                pl.BlockSpec((1, H), lambda i: (0, 0)),              # w2 row (f32)
                pl.BlockSpec(memory_space=pltpu.MemorySpace.SMEM),   # b2 scalar (SMEM)
            ],
            out_specs=pl.BlockSpec((1, bm), lambda i: (i, 0)),
        ),
        compiler_params=pltpu.CompilerParams(
            dimension_semantics=("parallel",),
        ),
    )(x_bf, w1_bf, b1_row, w2_row, b2_s)

    return out.reshape(B, 1)


def _reference_forward(x, w1, b1, w2, b2):
    h = x @ w1 + b1.reshape(1, -1)
    h = jnp.where(h >= 0.0, h, 0.1 * h)
    z = h @ w2.reshape(-1, 1) + b2.reshape(1, 1)
    return jax.nn.sigmoid(z)


if __name__ == "__main__":
    # Small, deterministic setup consistent with Discriminator(in_features=32)
    B, F, H = 8, 32, 128
    key = jax.random.PRNGKey(0)
    kx, kw1, kb1, kw2, kb2 = jax.random.split(key, 5)

    x = jax.random.normal(kx, (B, F), dtype=jnp.float32)
    # Deterministic synthetic params (roughly matching nn.Linear init scale)
    w1 = jax.random.uniform(kw1, (F, H), jnp.float32, -1.0 / F**0.5, 1.0 / F**0.5)
    b1 = jax.random.uniform(kb1, (1, H), jnp.float32, -1.0 / F**0.5, 1.0 / F**0.5)
    w2 = jax.random.uniform(kw2, (H, 1), jnp.float32, -1.0 / H**0.5, 1.0 / H**0.5)
    b2 = jax.random.uniform(kb2, (1, 1), jnp.float32, -1.0 / H**0.5, 1.0 / H**0.5)

    out = discriminator_forward(x, w1, b1, w2, b2)
    out = jax.block_until_ready(out)

    ref = _reference_forward(x, w1, b1, w2, b2)
    assert out.shape == (B, 1)
    # Tolerance widened for bf16 matmul inputs + approximate reciprocal.
    assert jnp.allclose(out, ref, atol=2e-2, rtol=2e-2), "mismatch vs reference"

    print("KERNEL_OK")
</pallas_src>

<mosaic_0001>
module attributes {stable_mosaic.version = 11 : i64} {
  func.func @_disc_kernel(%arg0: i32, %arg1: memref<8x32xbf16, #tpu.memory_space<vmem>>, %arg2: memref<32x128xbf16, #tpu.memory_space<vmem>>, %arg3: memref<1x128xf32, #tpu.memory_space<vmem>>, %arg4: memref<1x128xf32, #tpu.memory_space<vmem>>, %arg5: memref<1x1xf32, #tpu.memory_space<smem>>, %arg6: memref<1x8xf32, #tpu.memory_space<vmem>>) attributes {dimension_semantics = [#tpu.dimension_semantics<parallel>], iteration_bounds = array<i64: 1>, scalar_prefetch = 0 : i64, scratch_operands = 0 : i64, tpu.core_type = #tpu.core_type<tc>, window_params = [{transform_indices = @transform_0, window_bounds = array<i64: 8, 32>}, {pipeline_mode = #tpu.pipeline_mode<synchronous>, transform_indices = @transform_1, window_bounds = array<i64: 32, 128>}, {pipeline_mode = #tpu.pipeline_mode<synchronous>, transform_indices = @transform_2, window_bounds = array<i64: 1, 128>}, {pipeline_mode = #tpu.pipeline_mode<synchronous>, transform_indices = @transform_3, window_bounds = array<i64: 1, 128>}, {transform_indices = @transform_4, window_bounds = array<i64: 1, 1>}, {transform_indices = @transform_5, window_bounds = array<i64: 1, 8>}]} {
    %c0 = arith.constant 0 : index
    %c0_0 = arith.constant 0 : index
    %0 = vector.load %arg1[%c0, %c0_0] : memref<8x32xbf16, #tpu.memory_space<vmem>>, vector<8x32xbf16>
    %c0_1 = arith.constant 0 : index
    %c0_2 = arith.constant 0 : index
    %1 = vector.load %arg2[%c0_1, %c0_2] : memref<32x128xbf16, #tpu.memory_space<vmem>>, vector<32x128xbf16>
    %cst = arith.constant dense<0.000000e+00> : vector<8x128xf32>
    %2 = tpu.matmul %0, %1, %cst {dimension_numbers = #tpu.dot_dimension_numbers<[1], [0], [0], [1], [0, 0, 1, 1], [], []>} : vector<8x32xbf16>, vector<32x128xbf16>, vector<8x128xf32> -> vector<8x128xf32>
    %c0_3 = arith.constant 0 : index
    %c0_4 = arith.constant 0 : index
    %3 = vector.load %arg3[%c0_3, %c0_4] : memref<1x128xf32, #tpu.memory_space<vmem>>, vector<1x128xf32>
    %4 = vector.broadcast %3 : vector<1x128xf32> to vector<8x128xf32>
    %5 = arith.addf %2, %4 : vector<8x128xf32>
    %cst_5 = arith.constant 1.000000e-01 : f32
    %6 = vector.broadcast %cst_5 : f32 to vector<8x128xf32>
    %7 = arith.mulf %6, %5 : vector<8x128xf32>
    %8 = arith.maximumf %5, %7 : vector<8x128xf32>
    %c0_6 = arith.constant 0 : index
    %c0_7 = arith.constant 0 : index
    %9 = vector.load %arg4[%c0_6, %c0_7] : memref<1x128xf32, #tpu.memory_space<vmem>>, vector<1x128xf32>
    %10 = vector.broadcast %9 : vector<1x128xf32> to vector<8x128xf32>
    %11 = arith.mulf %8, %10 : vector<8x128xf32>
    %cst_8 = arith.constant dense<0.000000e+00> : vector<8xf32>
    %12 = vector.multi_reduction <add>, %11, %cst_8 [1] : vector<8x128xf32> to vector<8xf32>
    %c0_9 = arith.constant 0 : index
    %c0_10 = arith.constant 0 : index
    %13 = memref.load %arg5[%c0_9, %c0_10] : memref<1x1xf32, #tpu.memory_space<smem>>
    %14 = vector.broadcast %13 : f32 to vector<8xf32>
    %15 = arith.addf %12, %14 : vector<8xf32>
    %cst_11 = arith.constant 0.000000e+00 : f32
    %16 = vector.broadcast %cst_11 : f32 to vector<8xf32>
    %17 = arith.subf %16, %15 : vector<8xf32>
    %18 = math.exp %17 : vector<8xf32>
    %cst_12 = arith.constant 1.000000e+00 : f32
    %19 = vector.broadcast %cst_12 : f32 to vector<8xf32>
    %20 = arith.addf %19, %18 : vector<8xf32>
    %21 = tpu.reciprocal %20 {approx = true} : vector<8xf32> -> vector<8xf32>
    %c0_13 = arith.constant 0 : index
    %c0_14 = arith.constant 0 : index
    %22 = vector.load %arg6[%c0_13, %c0_14] : memref<1x8xf32, #tpu.memory_space<vmem>>, vector<1x8xf32>
    %23 = vector.shape_cast %22 : vector<1x8xf32> to vector<8xf32>
    %24 = vector.shape_cast %21 : vector<8xf32> to vector<1x8xf32>
    tpu.vector_store %arg6[%c0_13, %c0_14], %24 {strides = array<i32>} : memref<1x8xf32, #tpu.memory_space<vmem>>, vector<1x8xf32>,
    return
  }
  func.func @transform_0(%arg0: i32) -> (i32, i32) {
    %c0_i32 = arith.constant 0 : i32
    %c0_i32_0 = arith.constant 0 : i32
    return %arg0, %c0_i32 : i32, i32
  }
  func.func @transform_1(%arg0: i32) -> (i32, i32) {
    %c0_i32 = arith.constant 0 : i32
    %c0_i32_0 = arith.constant 0 : i32
    %c0_i32_1 = arith.constant 0 : i32
    return %c0_i32, %c0_i32_0 : i32, i32
  }
  func.func @transform_2(%arg0: i32) -> (i32, i32) {
    %c0_i32 = arith.constant 0 : i32
    %c0_i32_0 = arith.constant 0 : i32
    %c0_i32_1 = arith.constant 0 : i32
    return %c0_i32, %c0_i32_0 : i32, i32
  }
  func.func @transform_3(%arg0: i32) -> (i32, i32) {
    %c0_i32 = arith.constant 0 : i32
    %c0_i32_0 = arith.constant 0 : i32
    %c0_i32_1 = arith.constant 0 : i32
    return %c0_i32, %c0_i32_0 : i32, i32
  }
  func.func @transform_4(%arg0: i32) -> (i32, i32) {
    %c0_i32 = arith.constant 0 : i32
    %c0_i32_0 = arith.constant 0 : i32
    %c0_i32_1 = arith.constant 0 : i32
    return %c0_i32, %c0_i32_0 : i32, i32
  }
  func.func @transform_5(%arg0: i32) -> (i32, i32) {
    %c0_i32 = arith.constant 0 : i32
    %c0_i32_0 = arith.constant 0 : i32
    return %arg0, %c0_i32 : i32, i32
  }
}

</mosaic_0001>

<bundles_post_ra>
// kernel: tpu_custom_call.1
= control target key start
LH: loop header
LB: loop body
LE: loop exit
PB: predicated region body
PF: predicated region fallthrough
CT: control target
= control target key end

     0   :  { %11 = vsyncpa [#allocation4], 0  ;;  %s286_s0 = inlined_call_operand.hbm [shape: bf16[8,32], index: 0, kind: input, shape index: {}]   ;;  %s287_s1 = inlined_call_operand.hbm [shape: bf16[32,128], index: 1, kind: input, shape index: {}]   ;;  %s288_s2 = inlined_call_operand.vmem [shape: f32[1,128], index: 2, kind: input, shape index: {}]   ;;  %s289_s3 = inlined_call_operand.vmem [shape: f32[1,128], index: 3, kind: input, shape index: {}]   ;;  %s290_s4 = inlined_call_operand.<no memory space> [shape: f32[1,1], index: 4, kind: input, shape index: {}]   ;;  %s291_s5 = inlined_call_operand.hbm [shape: f32[1,8], index: 5, kind: output, shape index: {}]  }
   0x1   :  { %12 = vsyncpa [#allocation7], 0 }
   0x2   :  { %13 = vsyncpa [#allocation5], 0  ;;  %s19_s20 = sshll.u32 %s286_s0, 4  ;;  %s233_s21 = smov [#allocation3]   ;;  %s20_s20 = int_to_ptr.hbm [resolvable:$true] %s19_s20 }
   0x3   :  { %s21_s22 = sshll.u32 %s233_s21, 4  ;;  %s29_s25 = sshll.u32 %s287_s1, 4  ;;  %s22_s22 = int_to_ptr.vmem [resolvable:$true] %s21_s22  ;;  %s30_s25 = int_to_ptr.hbm [resolvable:$true] %s29_s25 }
   0x4   :  { %24 = dma.hbm_to_vmem [thread:$0]  %s20_s20, 64, %s22_s22, [#allocation4]  }
   0x5   :  { %s234_s26 = smov [#allocation6]   ;;  %s235_s28 = smov 64  }
   0x6   :  { %s31_s27 = sshll.u32 %s234_s26, 4  ;;  %s236_s29 = smov 4   ;;  %s32_s27 = int_to_ptr.vmem [resolvable:$true] %s31_s27 }
   0x7   :  { %37 = dma.hbm_to_vmem [thread:$0]  %s30_s25, 256, %s32_s27, [#allocation7], %s235_s28, %s235_s28, %s236_s29  }
   0x8   :  { %227 = dma.done.wait [#allocation4], 64  }
   0x9   :  { %228 = vsyncadd [#allocation4], 4294967232 }
   0xa   :  { %229 = dma.done.wait [#allocation7], 256  }
   0xb   :  { %230 = vsyncadd [#allocation7], 4294967040  ;;  %v143_v0 = vld [vmem:[#allocation6 + $0x8] sm:$0xff]  ;;  %v142_v1 = vld [vmem:[#allocation6] sm:$0xff]  ;;  %vm74_vm0 = vcmask 261120   ;;  %v101_v11 = vstv %s290_s4  ;;  %v109_v18 = vlaneseq  ;;  %s122_s11 = sshll.u32 %s291_s5, 4  ;;  %s123_s11 = int_to_ptr.hbm [resolvable:$true] %s122_s11 }
   0xc   :  { %84 = vmatpush.bf16.msra.mxu0 %v143_v0  ;;  %v53_v2 = vld [vmem:[#allocation3] sm:$0xf]  ;;  %vm113_vm1 = vcmask 57344  }
   0xd   :  { %v149_v3 = vld [vmem:[%s288_s2] ss:$0 sm:$0xff]  ;;  %v110_v19 = vand.u32 127, %v109_v18  ;;  %s237_s2 = smov [#allocation8]  }
   0xe   :  { %v150_v7 = vld [vmem:[%s289_s3] ss:$0 sm:$0xff]  ;;  %s120_s3 = sshll.u32 %s237_s2, 4  ;;  %s121_s3 = int_to_ptr.vmem [resolvable:$true] %s120_s3 }
  0x10   :  { %85 = vmatpush.bf16.msra.mxu0 %v142_v1 }
  0x13   :  { %141 = vmatmul.msk.bf16.vlgmr.msra.gmra.mxu0 %vm74_vm0, %v53_v2 }
  0x90   :  { %v87_v4 = vpop.f32.mrf.mxu0 }
  0x91   :  { %v88_v5 = vadd.f32 %v149_v3, %v87_v4 }
  0x93   :  { %v91_v6 = vmul.f32 0.1, %v88_v5 }
  0x95   :  { %v92_v8 = vmax.f32 %v88_v5, %v91_v6 }
  0x97   :  { %v97_v9 = vmul.f32 %v150_v7, %v92_v8 }
  0x98   :  { %v89_v10 = vpop.f32.mrf.mxu0 }
  0x99   :  { %98 = vadd.xlane.f32.xlu0 %v97_v9 }
 0x10c   :  { %v99_v12 = vpop.xlane.xlu0 %98 }
 0x10d   :  { %v102_v13 = vadd.f32 %v101_v11, %v99_v12 }
 0x10f   :  { %v103_v14 = vsub.f32 0.0, %v102_v13 }
 0x111   :  { %v104_v15 = vmul.f32 1.442695, %v103_v14 }
 0x113   :  { %151 = vpow2.f32 %v104_v15 }
 0x119   :  { %v152_v16 = vpop.eup %151 }
 0x11a   :  { %v106_v17 = vadd.f32 1.0, %v152_v16 }
 0x11c   :  { %153 = vrcp.f32 %v106_v17 }
 0x122   :  { %v154_v20 = vpop.eup %153 }
 0x123   :  { %v111_v21 = vperm.slane %v154_v20, %v110_v19 }
 0x125   :  { %114 = vst.msk [vmem:[#allocation8] sm:$0x1] %vm113_vm1, %v111_v21 }
 0x126   :  { %125 = dma.vmem_to_hbm [thread:$0]  %s121_s3, 16, %s123_s11, [#allocation5]  }
 0x127   :  { %231 = dma.done.wait [#allocation5], 16  }
 0x128   :  { %232 = vsyncadd [#allocation5], 4294967280 }
 0x129   :  { %130 = vsyncpa [#allocation4], 1 }
 0x12a   :  { %131 = vsyncpa [#allocation7], 1 }
 0x12b   :  { %132 = vsyncpa [#allocation5], 1 }

</bundles_post_ra>
